<compile_context>
chip_gen: v7x
topology: tpu7x:2x2x1
jax: 0.10.0
libtpu: 0.0.40
codegen_flags: <defaults>
</compile_context>

<pallas_src>
import functools

import jax
import jax.numpy as jnp
import numpy as np
from jax.experimental import pallas as pl
from jax.experimental.pallas import tpu as pltpu


def _update_index_matrix(batch_size: int, linear: bool = False) -> np.ndarray:
    """NumPy port of the PyTorch _update_index_matrix (used only by the reference)."""
    m = np.zeros((2 * batch_size, 2 * batch_size), dtype=np.float32)
    if linear:
        for i in range(batch_size):
            s1, s2 = i, (i + 1) % batch_size
            t1, t2 = s1 + batch_size, s2 + batch_size
            m[s1, s2] = 1.0 / batch_size
            m[t1, t2] = 1.0 / batch_size
            m[s1, t2] = -1.0 / batch_size
            m[s2, t1] = -1.0 / batch_size
    else:
        for i in range(batch_size):
            for j in range(batch_size):
                if i != j:
                    m[i, j] = 1.0 / (batch_size * (batch_size - 1))
                    m[i + batch_size, j + batch_size] = 1.0 / (batch_size * (batch_size - 1))
        for i in range(batch_size):
            for j in range(batch_size):
                m[i, j + batch_size] = -1.0 / (batch_size * batch_size)
                m[i + batch_size, j] = -1.0 / (batch_size * batch_size)
    return m


def _pow2_ladder_ratios(alphas):
    """If alphas form a power-of-two bandwidth ladder, return integer exponent ratios
    (relative to alpha_max), else None. Ratios are small static Python ints."""
    alpha_max = max(float(a) for a in alphas)
    ratios = []
    for a in alphas:
        r = alpha_max / float(a)
        ri = int(round(r))
        if abs(r - ri) > 1e-9 or ri < 1 or (ri & (ri - 1)) != 0 or ri > 64:
            return None
        ratios.append(ri)
    return ratios


def _mkmmd_kernel(feat_ref, out_ref, gram_acc, *, alphas, batch_size, n_valid, linear):
    """Grid axis 0 tiles the feature (contraction) dimension D.

    Every step accumulates a Gram-matrix chunk on the MXU; the last step runs the
    d2 / multi-kernel-Gaussian / weighted-reduction epilogue entirely in VMEM.
    """
    k = pl.program_id(0)

    @pl.when(k == 0)
    def _init():
        gram_acc[...] = jnp.zeros_like(gram_acc)

    fb = feat_ref[...]  # (Np, tk) f32 — zero-padded rows/cols contribute nothing.
    # Contract both operands on their last (lane) axis: no transpose materialized.
    gram_acc[...] += jax.lax.dot_general(
        fb, fb,
        dimension_numbers=(((1,), (1,)), ((), ())),
        preferred_element_type=jnp.float32,
    )

    @pl.when(k == pl.num_programs(0) - 1)
    def _epilogue():
        gram = gram_acc[...]                       # (Np, Np) f32
        npad = gram.shape[0]
        b = batch_size

        r = jax.lax.broadcasted_iota(jnp.int32, (npad, npad), 0)
        c = jax.lax.broadcasted_iota(jnp.int32, (npad, npad), 1)

        # Row norms from the Gram diagonal (no (Np,1) transpose needed).
        diag = jnp.where(r == c, gram, 0.0)
        sq_col = jnp.sum(diag, axis=1, keepdims=True)   # (Np, 1)
        sq_row = jnp.sum(diag, axis=0, keepdims=True)   # (1, Np)
        d2 = jnp.maximum(sq_col + sq_row - 2.0 * gram, 0.0)

        # Dynamic bandwidth: mean over the *valid* (unpadded) (2B, 2B) block.
        valid = (r < n_valid) & (c < n_valid)
        mean_d2 = jnp.sum(
            jnp.sum(jnp.where(valid, d2, 0.0), axis=1, keepdims=True),
            axis=0, keepdims=True) / float(n_valid * n_valid)        # (1, 1)

        # Multi-kernel Gaussian sum. Hoist all divisions to (1,1) scalars; when the
        # alphas are a power-of-two ladder, use one exp + repeated squaring (VPU)
        # instead of len(alphas) EUP exp passes.
        alpha_max = max(float(a) for a in alphas)
        ratios = _pow2_ladder_ratios(alphas)
        base_coef = (-0.5 / alpha_max) / mean_d2                      # exact scalar divide
        if ratios is not None:
            base = jnp.exp(d2 * base_coef)
            powers = {1: base}
            p, e = base, 1
            while e < max(ratios):
                p = p * p
                e *= 2
                powers[e] = p
            km = functools.reduce(lambda x, y: x + y, (powers[rt] for rt in ratios))
        else:
            km = jnp.zeros_like(d2)
            for a in alphas:
                coef = (-0.5 / float(a)) / mean_d2
                km = km + jnp.exp(d2 * coef)

        # Index-matrix weights generated in-kernel from block masks (no HBM input).
        r_src = r < b
        r_tgt = (r >= b) & (r < 2 * b)
        c_src = c < b
        c_tgt = (c >= b) & (c < 2 * b)
        if linear:
            ri = jnp.where(r_src, r, r - b)
            ci = jnp.where(c_src, c, c - b)
            succ = ci == (ri + 1) % b
            pred = ri == (ci + 1) % b
            same = (r_src & c_src) | (r_tgt & c_tgt)
            w = (jnp.where(same & succ, 1.0 / float(b), 0.0)
                 + jnp.where(r_src & c_tgt & (succ | pred), -1.0 / float(b), 0.0))
        else:
            same = (r_src & c_src) | (r_tgt & c_tgt)
            cross = (r_src & c_tgt) | (r_tgt & c_src)
            pos_w = 1.0 / float(b * (b - 1)) if b > 1 else 0.0
            w = (jnp.where(same & (r != c), pos_w, 0.0)
                 + jnp.where(cross, -1.0 / float(b * b), 0.0))

        loss2d = jnp.sum(jnp.sum(km * w, axis=1, keepdims=True), axis=0, keepdims=True)
        out_ref[...] = loss2d + 2.0 / float(b - 1)


def _round_up(x: int, m: int) -> int:
    return ((x + m - 1) // m) * m


def mk_mmd_loss(z_s, z_t, alphas=(0.125, 0.25, 0.5, 1.0, 2.0), linear=False):
    """MK-MMD loss between source features z_s (B, D) and target features z_t (B, D)."""
    assert z_s.shape == z_t.shape and z_s.ndim == 2
    batch_size, dim = z_s.shape
    n = 2 * batch_size

    features = jnp.concatenate([z_s, z_t], axis=0).astype(jnp.float32)   # (2B, D)

    # Pad rows to a sublane multiple and the feature dim to a lane multiple so every
    # vreg / MXU column is dense. Zero padding is inert for Gram / row norms, and the
    # epilogue masks padded rows/cols out of mean_d2 and the weighted sum.
    n_pad = _round_up(n, 8)
    d_pad = _round_up(dim, 128)
    tk = d_pad if d_pad <= 512 else 512
    d_pad = _round_up(d_pad, tk)
    features = jnp.pad(features, ((0, n_pad - n), (0, d_pad - dim)))

    n_exp = 1 if _pow2_ladder_ratios(alphas) is not None else len(alphas)
    kernel = functools.partial(
        _mkmmd_kernel, alphas=tuple(float(a) for a in alphas),
        batch_size=batch_size, n_valid=n, linear=linear)

    # Keep the scoped-VMEM request modest and bounded (v7x has only 64 MiB physical).
    est_bytes = 2 * n_pad * tk * 4 + 10 * n_pad * n_pad * 4
    vmem_limit = min(max(32 * 1024 * 1024, int(1.25 * est_bytes)), 64 * 1024 * 1024)

    out = pl.pallas_call(
        kernel,
        out_shape=jax.ShapeDtypeStruct((1, 1), jnp.float32),
        grid_spec=pltpu.PrefetchScalarGridSpec(
            num_scalar_prefetch=0,
            grid=(d_pad // tk,),
            in_specs=[pl.BlockSpec((n_pad, tk), lambda k: (0, k))],
            out_specs=pl.BlockSpec((1, 1), lambda k: (0, 0)),
            scratch_shapes=[pltpu.VMEM((n_pad, n_pad), jnp.float32)],
        ),
        compiler_params=pltpu.CompilerParams(
            dimension_semantics=("arbitrary",),   # D is a reduction axis
            vmem_limit_bytes=vmem_limit,
        ),
        cost_estimate=pl.CostEstimate(
            flops=2 * n_pad * n_pad * d_pad + 16 * n_pad * n_pad,
            transcendentals=n_exp * n_pad * n_pad,
            bytes_accessed=n_pad * d_pad * 4 + 4,
        ),
    )(features)
    return out[0, 0]


def _reference(z_s, z_t, alphas=(0.125, 0.25, 0.5, 1.0, 2.0), linear=False):
    """Pure-JAX reference (exact per-alpha exp with divides, difference-based d2)."""
    b = z_s.shape[0]
    f = jnp.concatenate([z_s, z_t], axis=0).astype(jnp.float32)
    d2 = jnp.sum((f[:, None, :] - f[None, :, :]) ** 2, axis=-1)
    mean_d2 = jnp.mean(d2)
    km = sum(jnp.exp(-d2 / (2.0 * a * mean_d2)) for a in alphas)
    idx = jnp.asarray(_update_index_matrix(b, linear))
    return jnp.sum(km * idx) + 2.0 / (b - 1)


if __name__ == "__main__":
    key = jax.random.PRNGKey(0)
    k1, k2 = jax.random.split(key)
    B, D = 4, 32
    z_s = jax.random.normal(k1, (B, D), dtype=jnp.float32)
    z_t = jax.random.normal(k2, (B, D), dtype=jnp.float32) + 0.5

    loss = mk_mmd_loss(z_s, z_t)
    jax.block_until_ready(loss)

    ref = _reference(z_s, z_t)
    # Tolerance slightly above 1e-5: the one-exp + repeated-squaring ladder and the
    # Gram-based distances differ from the per-alpha-exp reference by a few f32 ULPs.
    assert jnp.allclose(loss, ref, rtol=2e-5, atol=2e-5), (loss, ref)
    print("KERNEL_OK")
</pallas_src>

<mosaic_0001>
module attributes {stable_mosaic.version = 11 : i64} {
  func.func @_mkmmd_kernel(%arg0: i32, %arg1: memref<8x128xf32, #tpu.memory_space<vmem>>, %arg2: memref<1x1xf32, #tpu.memory_space<vmem>>, %arg3: memref<8x8xf32, #tpu.memory_space<vmem>>) attributes {dimension_semantics = [#tpu.dimension_semantics<arbitrary>], iteration_bounds = array<i64: 1>, scalar_prefetch = 0 : i64, scratch_operands = 1 : i64, tpu.core_type = #tpu.core_type<tc>, window_params = [{transform_indices = @transform_0, window_bounds = array<i64: 8, 128>}, {pipeline_mode = #tpu.pipeline_mode<synchronous>, transform_indices = @transform_1, window_bounds = array<i64: 1, 1>}]} {
    %c0_i32 = arith.constant 0 : i32
    %0 = arith.cmpi eq, %arg0, %c0_i32 : i32
    %1 = arith.extui %0 : i1 to i32
    %c0_i32_0 = arith.constant 0 : i32
    %2 = arith.cmpi ne, %1, %c0_i32_0 : i32
    scf.if %2 {
      %cst_8 = arith.constant 0.000000e+00 : f32
      %11 = vector.broadcast %cst_8 : f32 to vector<8x8xf32>
      %c0_9 = arith.constant 0 : index
      %c0_10 = arith.constant 0 : index
      %12 = vector.load %arg3[%c0_9, %c0_10] : memref<8x8xf32, #tpu.memory_space<vmem>>, vector<8x8xf32>
      tpu.vector_store %arg3[%c0_9, %c0_10], %11 {strides = array<i32>} : memref<8x8xf32, #tpu.memory_space<vmem>>, vector<8x8xf32>,
    } else {
    }
    %c0 = arith.constant 0 : index
    %c0_1 = arith.constant 0 : index
    %3 = vector.load %arg1[%c0, %c0_1] : memref<8x128xf32, #tpu.memory_space<vmem>>, vector<8x128xf32>
    %c0_2 = arith.constant 0 : index
    %c0_3 = arith.constant 0 : index
    %4 = vector.load %arg3[%c0_2, %c0_3] : memref<8x8xf32, #tpu.memory_space<vmem>>, vector<8x8xf32>
    %cst = arith.constant dense<0.000000e+00> : vector<8x8xf32>
    %5 = tpu.matmul %3, %3, %cst {dimension_numbers = #tpu.dot_dimension_numbers<[1], [1], [0], [0], [0, 0, 1, 0], [], []>} : vector<8x128xf32>, vector<8x128xf32>, vector<8x8xf32> -> vector<8x8xf32>
    %6 = arith.addf %4, %5 : vector<8x8xf32>
    %c0_4 = arith.constant 0 : index
    %c0_5 = arith.constant 0 : index
    %7 = vector.load %arg3[%c0_4, %c0_5] : memref<8x8xf32, #tpu.memory_space<vmem>>, vector<8x8xf32>
    tpu.vector_store %arg3[%c0_4, %c0_5], %6 {strides = array<i32>} : memref<8x8xf32, #tpu.memory_space<vmem>>, vector<8x8xf32>,
    %c0_i32_6 = arith.constant 0 : i32
    %8 = arith.cmpi eq, %arg0, %c0_i32_6 : i32
    %9 = arith.extui %8 : i1 to i32
    %c0_i32_7 = arith.constant 0 : i32
    %10 = arith.cmpi ne, %9, %c0_i32_7 : i32
    scf.if %10 {
      %c0_8 = arith.constant 0 : index
      %c0_9 = arith.constant 0 : index
      %11 = vector.load %arg3[%c0_8, %c0_9] : memref<8x8xf32, #tpu.memory_space<vmem>>, vector<8x8xf32>
      %12 = tpu.iota {dimensions = array<i32: 0>} : vector<8x8xi32>
      %13 = tpu.iota {dimensions = array<i32: 1>} : vector<8x8xi32>
      %14 = arith.cmpi eq, %12, %13 : vector<8x8xi32>
      %cst_10 = arith.constant 0.000000e+00 : f32
      %15 = vector.broadcast %cst_10 : f32 to vector<8x8xf32>
      %16 = arith.select %14, %11, %15 : vector<8x8xi1>, vector<8x8xf32>
      %cst_11 = arith.constant dense<0.000000e+00> : vector<8xf32>
      %17 = vector.multi_reduction <add>, %16, %cst_11 [1] : vector<8x8xf32> to vector<8xf32>
      %18 = vector.shape_cast %17 : vector<8xf32> to vector<8x1xf32>
      %cst_12 = arith.constant dense<0.000000e+00> : vector<8xf32>
      %19 = vector.multi_reduction <add>, %16, %cst_12 [0] : vector<8x8xf32> to vector<8xf32>
      %20 = vector.shape_cast %19 : vector<8xf32> to vector<1x8xf32>
      %21 = vector.broadcast %18 : vector<8x1xf32> to vector<8x8xf32>
      %22 = vector.broadcast %20 : vector<1x8xf32> to vector<8x8xf32>
      %23 = arith.addf %21, %22 : vector<8x8xf32>
      %cst_13 = arith.constant 2.000000e+00 : f32
      %24 = vector.broadcast %cst_13 : f32 to vector<8x8xf32>
      %25 = arith.mulf %24, %11 : vector<8x8xf32>
      %26 = arith.subf %23, %25 : vector<8x8xf32>
      %cst_14 = arith.constant 0.000000e+00 : f32
      %27 = vector.broadcast %cst_14 : f32 to vector<8x8xf32>
      %28 = arith.maximumf %26, %27 : vector<8x8xf32>
      %c8_i32 = arith.constant 8 : i32
      %29 = vector.broadcast %c8_i32 : i32 to vector<8x8xi32>
      %30 = arith.cmpi slt, %12, %29 : vector<8x8xi32>
      %c8_i32_15 = arith.constant 8 : i32
      %31 = vector.broadcast %c8_i32_15 : i32 to vector<8x8xi32>
      %32 = arith.cmpi slt, %13, %31 : vector<8x8xi32>
      %33 = arith.andi %30, %32 : vector<8x8xi1>
      %cst_16 = arith.constant 0.000000e+00 : f32
      %34 = vector.broadcast %cst_16 : f32 to vector<8x8xf32>
      %35 = arith.select %33, %28, %34 : vector<8x8xi1>, vector<8x8xf32>
      %cst_17 = arith.constant dense<0.000000e+00> : vector<8xf32>
      %36 = vector.multi_reduction <add>, %35, %cst_17 [1] : vector<8x8xf32> to vector<8xf32>
      %37 = vector.shape_cast %36 : vector<8xf32> to vector<8x1xf32>
      %cst_18 = arith.constant dense<0.000000e+00> : vector<1xf32>
      %38 = vector.multi_reduction <add>, %37, %cst_18 [0] : vector<8x1xf32> to vector<1xf32>
      %39 = vector.shape_cast %38 : vector<1xf32> to vector<1x1xf32>
      %cst_19 = arith.constant 6.400000e+01 : f32
      %40 = vector.broadcast %cst_19 : f32 to vector<1x1xf32>
      %41 = arith.divf %39, %40 : vector<1x1xf32>
      %cst_20 = arith.constant -2.500000e-01 : f32
      %42 = vector.broadcast %cst_20 : f32 to vector<1x1xf32>
      %43 = arith.divf %42, %41 : vector<1x1xf32>
      %44 = vector.broadcast %43 : vector<1x1xf32> to vector<8x8xf32>
      %45 = arith.mulf %28, %44 : vector<8x8xf32>
      %46 = math.exp %45 : vector<8x8xf32>
      %47 = arith.mulf %46, %46 : vector<8x8xf32>
      %48 = arith.mulf %47, %47 : vector<8x8xf32>
      %49 = arith.mulf %48, %48 : vector<8x8xf32>
      %50 = arith.mulf %49, %49 : vector<8x8xf32>
      %51 = arith.addf %50, %49 : vector<8x8xf32>
      %52 = arith.addf %51, %48 : vector<8x8xf32>
      %53 = arith.addf %52, %47 : vector<8x8xf32>
      %54 = arith.addf %53, %46 : vector<8x8xf32>
      %c4_i32 = arith.constant 4 : i32
      %55 = vector.broadcast %c4_i32 : i32 to vector<8x8xi32>
      %56 = arith.cmpi slt, %12, %55 : vector<8x8xi32>
      %c4_i32_21 = arith.constant 4 : i32
      %57 = vector.broadcast %c4_i32_21 : i32 to vector<8x8xi32>
      %58 = arith.cmpi sge, %12, %57 : vector<8x8xi32>
      %c8_i32_22 = arith.constant 8 : i32
      %59 = vector.broadcast %c8_i32_22 : i32 to vector<8x8xi32>
      %60 = arith.cmpi slt, %12, %59 : vector<8x8xi32>
      %61 = arith.andi %58, %60 : vector<8x8xi1>
      %c4_i32_23 = arith.constant 4 : i32
      %62 = vector.broadcast %c4_i32_23 : i32 to vector<8x8xi32>
      %63 = arith.cmpi slt, %13, %62 : vector<8x8xi32>
      %c4_i32_24 = arith.constant 4 : i32
      %64 = vector.broadcast %c4_i32_24 : i32 to vector<8x8xi32>
      %65 = arith.cmpi sge, %13, %64 : vector<8x8xi32>
      %c8_i32_25 = arith.constant 8 : i32
      %66 = vector.broadcast %c8_i32_25 : i32 to vector<8x8xi32>
      %67 = arith.cmpi slt, %13, %66 : vector<8x8xi32>
      %68 = arith.andi %65, %67 : vector<8x8xi1>
      %69 = arith.andi %56, %63 : vector<8x8xi1>
      %70 = arith.andi %61, %68 : vector<8x8xi1>
      %71 = arith.ori %69, %70 : vector<8x8xi1>
      %72 = arith.andi %56, %68 : vector<8x8xi1>
      %73 = arith.andi %61, %63 : vector<8x8xi1>
      %74 = arith.ori %72, %73 : vector<8x8xi1>
      %75 = arith.cmpi ne, %12, %13 : vector<8x8xi32>
      %76 = arith.andi %71, %75 : vector<8x8xi1>
      %cst_26 = arith.constant 0.0833333358 : f32
      %cst_27 = arith.constant 0.000000e+00 : f32
      %77 = vector.broadcast %cst_26 : f32 to vector<8x8xf32>
      %78 = vector.broadcast %cst_27 : f32 to vector<8x8xf32>
      %79 = arith.select %76, %77, %78 : vector<8x8xi1>, vector<8x8xf32>
      %cst_28 = arith.constant -6.250000e-02 : f32
      %cst_29 = arith.constant 0.000000e+00 : f32
      %80 = vector.broadcast %cst_28 : f32 to vector<8x8xf32>
      %81 = vector.broadcast %cst_29 : f32 to vector<8x8xf32>
      %82 = arith.select %74, %80, %81 : vector<8x8xi1>, vector<8x8xf32>
      %83 = arith.addf %79, %82 : vector<8x8xf32>
      %84 = arith.mulf %54, %83 : vector<8x8xf32>
      %cst_30 = arith.constant dense<0.000000e+00> : vector<8xf32>
      %85 = vector.multi_reduction <add>, %84, %cst_30 [1] : vector<8x8xf32> to vector<8xf32>
      %86 = vector.shape_cast %85 : vector<8xf32> to vector<8x1xf32>
      %cst_31 = arith.constant dense<0.000000e+00> : vector<1xf32>
      %87 = vector.multi_reduction <add>, %86, %cst_31 [0] : vector<8x1xf32> to vector<1xf32>
      %88 = vector.shape_cast %87 : vector<1xf32> to vector<1x1xf32>
      %cst_32 = arith.constant 0.666666686 : f32
      %89 = vector.broadcast %cst_32 : f32 to vector<1x1xf32>
      %90 = arith.addf %88, %89 : vector<1x1xf32>
      %c0_33 = arith.constant 0 : index
      %c0_34 = arith.constant 0 : index
      %91 = vector.load %arg2[%c0_33, %c0_34] : memref<1x1xf32, #tpu.memory_space<vmem>>, vector<1x1xf32>
      tpu.vector_store %arg2[%c0_33, %c0_34], %90 {strides = array<i32>} : memref<1x1xf32, #tpu.memory_space<vmem>>, vector<1x1xf32>,
    } else {
    }
    return
  }
  func.func @transform_0(%arg0: i32) -> (i32, i32) {
    %c0_i32 = arith.constant 0 : i32
    %c0_i32_0 = arith.constant 0 : i32
    return %c0_i32, %arg0 : i32, i32
  }
  func.func @transform_1(%arg0: i32) -> (i32, i32) {
    %c0_i32 = arith.constant 0 : i32
    %c0_i32_0 = arith.constant 0 : i32
    %c0_i32_1 = arith.constant 0 : i32
    return %c0_i32, %c0_i32_0 : i32, i32
  }
}

</mosaic_0001>

<bundles_post_ra>
// kernel: tpu_custom_call.1
= control target key start
LH: loop header
LB: loop body
LE: loop exit
PB: predicated region body
PF: predicated region fallthrough
CT: control target
= control target key end

     0   :  { %6 = vsyncpa [#allocation4], 0  ;;  %s311_s0 = inlined_call_operand.hbm [shape: f32[8,128], index: 0, kind: input, shape index: {}]   ;;  %s312_s1 = inlined_call_operand.hbm [shape: f32[1,1], index: 1, kind: output, shape index: {}]  }
   0x1   :  { %7 = vsyncpa [#allocation5], 0  ;;  %s261_s6 = smov [#allocation3]   ;;  %s213_s10 = scalar_lea.hbm %s311_s0, 128 }
   0x2   :  { %s14_s7 = sshll.u32 %s261_s6, 4  ;;  %p214_p0 = scmp.ne.s32.totalorder %s311_s0, %s213_s10  ;;  %s15_s7 = int_to_ptr.vmem [resolvable:$true] %s14_s7 }
   0x3   :  { %p217_p1 = scmp.lt.u32.totalorder %s213_s10, %s311_s0 }
   0x5   :  { %p219_p2 = pnand %p217_p1, %p214_p0 }
   0x7   :  { %222 = shalt.err (!%p219_p2)
}
   0x8   :  { %s223_s15 = scalar_lea.vmem %s15_s7, 128  ;;  %p228_p4 = scmp.lt.s32.totalorder %s15_s7, %s15_s7 }
   0x9   :  { %p224_p3 = scmp.ne.s32.totalorder %s15_s7, %s223_s15  ;;  %p229_p5 = scmp.lt.s32.totalorder %s223_s15, %s223_s15 }
   0xb   :  { %p230_p6 = por %p229_p5, %p228_p4 }
   0xd   :  { %p231_p7 = pnand %p230_p6, %p224_p3 }
   0xf   :  { %234 = shalt.err (!%p231_p7)
}
  0x10   :  { %17 = dma.hbm_to_vmem [thread:$0]  %s311_s0, 128, %s15_s7, [#allocation4]  }
  0x11   :  { %257 = dma.done.wait [#allocation4], 128  }
  0x12   :  { %258 = vsyncadd [#allocation4], 4294967168  ;;  %vm25_vm0 = vcmask 64512   ;;  %v262_v0 = vmov 0.0   ;;  %vm263_vm1 = vmmov 0   ;;  %v27_v1 = vld [vmem:[#allocation3] sm:$0xff]  ;;  %v106_v4 = vlaneseq }
  0x13   :  { %200 = vmatprep.subr.mxu0 %v262_v0  ;;  %202 = vmatprep.mubr.msk.f32.mxu0 %vm263_vm1, %v262_v0  ;;  %26 = vst.msk [vmem:[#allocation2] sm:$0xff] %vm25_vm0, %v262_v0  ;;  %s264_s0 = smov [#allocation6]  }
  0x14   :  { %201 = vmatpush3.xpose.msra.mxu0 %v27_v1  ;;  %v107_v7 = vshrl.u32 %v106_v4, 7  ;;  %v109_v8 = vand.u32 127, %v106_v4  ;;  %s189_s18 = sshll.u32 %s264_s0, 4  ;;  %s190_s18 = int_to_ptr.vmem [resolvable:$true] %s189_s18 }
  0x15   :  { %s235_s19 = scalar_lea.vmem %s190_s18, 16  ;;  %s239_s20 = scalar_lea.vmem %s190_s18, 32 }
  0x16   :  { %vm110_vm2 = vcmp.eq.s32.totalorder %v107_v7, %v109_v8  ;;  %vm126_vm3 = vcmp.lt.s32.totalorder %v109_v8, 8  ;;  %vm157_vm4 = vcmp.ge.s32.totalorder %v109_v8, 4  ;;  %vm153_vm5 = vcmp.lt.s32.totalorder %v107_v7, 4  ;;  %p236_p8 = scmp.ne.s32.totalorder %s190_s18, %s235_s19  ;;  %p240_p9 = scmp.lt.s32.totalorder %s190_s18, %s190_s18 }
  0x17   :  { %203 = vmatmul.mubr.f32.vlgmr.msra.gmra.mrb[0].mxu0 %v27_v1  ;;  %vm156_vm6 = vcmp.lt.s32.totalorder %v109_v8, 4  ;;  %vm154_vm7 = vcmp.ge.s32.totalorder %v107_v7, 4  ;;  %vm158_vm8 = vmand %vm157_vm4, %vm126_vm3  ;;  %vm165_vm14 = vcmp.ne.s32.totalorder %v107_v7, %v109_v8  ;;  %p241_p10 = scmp.lt.s32.totalorder %s239_s20, %s235_s19 }
  0x18   :  { %vm159_vm9 = vmand %vm153_vm5, %vm156_vm6 }
  0x19   :  { %vm160_vm10 = vmand %vm154_vm7, %vm158_vm8  ;;  %p242_p11 = por %p241_p10, %p240_p9 }
  0x1a   :  { %v28_v2 = vld [vmem:[#allocation2] sm:$0xff]  ;;  %vm162_vm11 = vmand %vm153_vm5, %vm158_vm8 }
  0x1b   :  { %vm163_vm12 = vmand %vm154_vm7, %vm156_vm6  ;;  %p243_p12 = pnand %p242_p11, %p236_p8 }
  0x1c   :  { %vm161_vm13 = vmor %vm159_vm9, %vm160_vm10 }
  0x1d   :  { %vm164_vm15 = vmor %vm162_vm11, %vm163_vm12 }
  0x1e   :  { %vm166_vm1 = vmand %vm161_vm13, %vm165_vm14  ;;  %v168_v44 = vsel %vm164_vm15, -0.0625, %v262_v0 }
  0x1f   :  { %v167_v43 = vsel %vm166_vm1, 0.083333336, %v262_v0 }
  0x20   :  { %v169_v47 = vadd.f32 %v168_v44, %v167_v43 }
  0xea   :  { %v95_v3 = vpop.f32.mrb[0].mxu0 }
  0xeb   :  { %v99_v5 = vadd.f32 %v95_v3, %v28_v2  ;;  %v204_v6 = vpop.f32.mrb[1].mxu0 }
  0xed   :  { %101 = vst.msk [vmem:[#allocation2] sm:$0xff] %vm25_vm0, %v99_v5 }
  0xf4   :  { %v105_v9 = vld [vmem:[#allocation2] sm:$0xff] }
  0xf5   :  { %v111_v10 = vsel %vm110_vm2, %v105_v9, 0.0  ;;  %v122_v19 = vmul.f32 2.0, %v105_v9  ;;  %vm181_vm2 = vcmask 0  }
  0xf6   :  { %v112_v11 = vsel %vm25_vm0, %v111_v10, 0.0 }
  0xf7   :  { %113 = vadd.xlane.f32.xlu0 %v112_v11  ;;  %v115_v12 = vrot.slane %v112_v11, 4 }
  0xf9   :  { %v116_v13 = vadd.f32 %v115_v12, %v112_v11 }
  0xfb   :  { %v117_v14 = vrot.slane %v116_v13, 2 }
  0xfd   :  { %v118_v15 = vadd.f32 %v117_v14, %v116_v13 }
  0xff   :  { %v119_v16 = vrot.slane %v118_v15, 1 }
 0x101   :  { %v120_v17 = vadd.f32 %v119_v16, %v118_v15 }
 0x184   :  { %v114_v18 = vpop.xlane.xlu0 %113 }
 0x185   :  { %v121_v20 = vadd.f32 %v120_v17, %v114_v18 }
 0x187   :  { %v123_v21 = vsub.f32 %v121_v20, %v122_v19 }
 0x189   :  { %v124_v22 = vmax.f32 %v123_v21, 0.0 }
 0x18b   :  { %v128_v23 = vsel %vm126_vm3, %v124_v22, 0.0 }
 0x18c   :  { %v129_v24 = vsel %vm25_vm0, %v128_v23, 0.0 }
 0x18d   :  { %130 = vadd.xlane.f32.xlu0 %v129_v24 }
 0x21a   :  { %v131_v25 = vpop.xlane.xlu0 %130 }
 0x21b   :  { %v132_v26 = vrot.slane %v131_v25, 4 }
 0x21d   :  { %v133_v27 = vadd.f32 %v132_v26, %v131_v25 }
 0x21f   :  { %v134_v28 = vrot.slane %v133_v27, 2 }
 0x221   :  { %v135_v29 = vadd.f32 %v134_v28, %v133_v27 }
 0x223   :  { %v136_v30 = vrot.slane %v135_v29, 1 }
 0x225   :  { %v137_v31 = vadd.f32 %v136_v30, %v135_v29 }
 0x227   :  { %v139_v32 = vmul.f32 0.015625, %v137_v31 }
 0x229   :  { %209 = vrcp.f32 %v139_v32 }
 0x233   :  { %v210_v33 = vpop.eup %209 }
 0x234   :  { %v141_v34 = vmul.f32 -0.25, %v210_v33 }
 0x236   :  { %v142_v35 = vmul.f32 %v141_v34, %v124_v22 }
 0x238   :  { %v143_v36 = vmul.f32 1.442695, %v142_v35 }
 0x23a   :  { %211 = vpow2.f32 %v143_v36 }
 0x244   :  { %v212_v37 = vpop.eup %211 }
 0x245   :  { %v145_v38 = vmul.f32 %v212_v37, %v212_v37 }
 0x247   :  { %v146_v39 = vmul.f32 %v145_v38, %v145_v38 }
 0x249   :  { %v147_v40 = vmul.f32 %v146_v39, %v146_v39 }
 0x24b   :  { %v148_v41 = vmul.f32 %v147_v40, %v147_v40 }
 0x24d   :  { %v149_v42 = vadd.f32 %v148_v41, %v147_v40 }
 0x24f   :  { %v150_v45 = vadd.f32 %v149_v42, %v146_v39 }
 0x251   :  { %v151_v46 = vadd.f32 %v150_v45, %v145_v38 }
 0x253   :  { %v152_v48 = vadd.f32 %v212_v37, %v151_v46 }
 0x255   :  { %v170_v49 = vmul.f32 %v169_v47, %v152_v48 }
 0x257   :  { %v171_v50 = vsel %vm25_vm0, %v170_v49, 0.0 }
 0x258   :  { %172 = vadd.xlane.f32.xlu1 %v171_v50 }
 0x2e5   :  { %v173_v51 = vpop.xlane.xlu1 %172 }
 0x2e6   :  { %v174_v52 = vrot.slane %v173_v51, 4 }
 0x2e8   :  { %v175_v53 = vadd.f32 %v174_v52, %v173_v51 }
 0x2ea   :  { %v176_v54 = vrot.slane %v175_v53, 2 }
 0x2ec   :  { %v177_v55 = vadd.f32 %v176_v54, %v175_v53 }
 0x2ee   :  { %v178_v56 = vrot.slane %v177_v55, 1 }
 0x2f0   :  { %v179_v57 = vadd.f32 %v178_v56, %v177_v55 }
 0x2f2   :  { %v180_v58 = vadd.f32 0.6666667, %v179_v57 }
 0x2f4   :  { %182 = vst.msk [vmem:[#allocation6] sm:$0x1] %vm181_vm2, %v180_v58 }
 0x2f5   :  { %246 = shalt.err (!%p243_p12)
}
 0x2f6   :  { %s247_s23 = scalar_lea.hbm %s312_s1, 16 }
 0x2f7   :  { %p248_p13 = scmp.ne.s32.totalorder %s312_s1, %s247_s23  ;;  %p251_p0 = scmp.lt.u32.totalorder %s247_s23, %s312_s1 }
 0x2f9   :  { %p253_p1 = pnand %p251_p0, %p248_p13 }
 0x2fb   :  { %256 = shalt.err (!%p253_p1)
}
 0x2fc   :  { %192 = dma.vmem_to_hbm [thread:$0]  %s190_s18, 16, %s312_s1, [#allocation5]  }
 0x2fd   :  { %259 = dma.done.wait [#allocation5], 16  }
 0x2fe   :  { %260 = vsyncadd [#allocation5], 4294967280 }
 0x2ff   :  { %196 = vsyncpa [#allocation4], 1 }
 0x300   :  { %197 = vsyncpa [#allocation5], 1 }

</bundles_post_ra>
